<compile_context>
chip_gen: v7x
topology: tpu7x:2x2x1
jax: 0.10.0
libtpu: 0.0.40
codegen_flags: <defaults>
</compile_context>

<pallas_src>
import jax
import jax.numpy as jnp
import numpy as np
from jax.experimental import pallas as pl
from jax.experimental.pallas import tpu as pltpu

HIDDEN = 64           # logical hidden size (matches the PyTorch module)
LANE = 128            # TPU lane width: hidden dim is zero-padded to this
SUBLANE = 8           # f32 sublane granularity for the batch dim
LEAKY_SLOPE = 0.01    # torch.nn.LeakyReLU default negative_slope
MAX_BATCH_TILE = 2048 # large tiles amortize the ~0.35us per-grid-step overhead
MIN_SPLIT_ROWS = 256  # once B >= this, use >= 2 balanced tiles (v7x: 2 TCs)


def _round_up(x, m):
    return (x + m - 1) // m * m


def _cdiv(a, b):
    return -(-a // b)


def _leaky_relu(x):
    # 2 VALU ops (vmul + vmax) instead of 3 (vcmp + vsel + vmul).
    return jnp.maximum(x, LEAKY_SLOPE * x)


def _pick_batch_tiling(batch):
    """Balanced, sublane-aligned batch tiles; >=2 (even) tiles for large B."""
    nt = max(1, _cdiv(batch, MAX_BATCH_TILE))
    if batch >= MIN_SPLIT_ROWS:
        nt = max(nt, 2)
        if nt % 2:
            nt += 1                     # even step count for v7x's 2 TensorCores
    tm = _round_up(_cdiv(batch, nt), SUBLANE)
    nt = _cdiv(batch, tm)
    return tm, nt * tm                  # (tile rows, padded batch)


def mlp_kernel(x_ref, w1_ref, w2_ref, w3_ref, w4_ref, b_ref, o_ref):
    # One batch tile per grid step. Padded weights + packed biases are resident
    # in VMEM, so the whole 4-layer MLP (4 MXU matmuls + LeakyReLU) runs here.
    dt = w1_ref.dtype                    # f32, or bf16 for the MXU-fast path
    hid = w1_ref.shape[1]                # padded hidden (128)
    d_out = o_ref.shape[1]               # true output width (8)
    b = b_ref[...]                       # (4, LANE) packed biases, f32

    x = x_ref[...].astype(dt)            # (tm, d_in) at true d_in
    h = _leaky_relu(jnp.dot(x, w1_ref[...],
                            preferred_element_type=jnp.float32) + b[0:1, :hid])
    h = _leaky_relu(jnp.dot(h.astype(dt), w2_ref[...],
                            preferred_element_type=jnp.float32) + b[1:2, :hid])
    h = _leaky_relu(jnp.dot(h.astype(dt), w3_ref[...],
                            preferred_element_type=jnp.float32) + b[2:3, :hid])
    o_ref[...] = (jnp.dot(h.astype(dt), w4_ref[...],
                          preferred_element_type=jnp.float32)
                  + b[3:4, :d_out]).astype(o_ref.dtype)


@jax.jit
def mlp_forward(x, weights, b_packed):
    """x: (B, input_size) f32.

    weights: (d_in, 128), (128, 128), (128, 128), (128, d_out) matrices
             (f32 or bf16); b_packed: (4, LANE) f32. Returns (B, d_out) f32.
    """
    w1, w2, w3, w4 = weights
    batch, d_in = x.shape
    d_out = w4.shape[1]

    tm, b_pad = _pick_batch_tiling(batch)
    x = x.astype(jnp.float32)
    if b_pad != batch:
        x = jnp.pad(x, ((0, b_pad - batch), (0, 0)))   # rows only; lanes untouched

    resident = lambda shape: pl.BlockSpec(shape, lambda i: (0, 0))
    out = pl.pallas_call(
        mlp_kernel,
        out_shape=jax.ShapeDtypeStruct((b_pad, d_out), jnp.float32),
        grid=(b_pad // tm,),
        in_specs=[
            pl.BlockSpec((tm, d_in), lambda i: (i, 0)),   # batch-tiled x, true d_in
            resident(w1.shape), resident(w2.shape),       # weights resident in VMEM
            resident(w3.shape), resident(w4.shape),
            resident(b_packed.shape),                     # packed biases
        ],
        out_specs=pl.BlockSpec((tm, d_out), lambda i: (i, 0)),  # true-width output
        compiler_params=pltpu.CompilerParams(
            dimension_semantics=("parallel",)),           # shard batch tiles across TCs
    )(x, w1, w2, w3, w4, b_packed)
    return out[:batch] if b_pad != batch else out


def _orthogonal(key, rows, cols, gain):
    """Deterministic orthogonal init (like torch.nn.init.orthogonal_), gain-scaled.

    Returns a (rows, cols) matrix (PyTorch weight layout: (out_features, in_features)).
    """
    flat = jax.random.normal(key, (rows, cols), dtype=jnp.float32)
    if rows < cols:
        flat = flat.T
    q, r = jnp.linalg.qr(flat)
    d = jnp.sign(jnp.diagonal(r))
    q = q * d[None, :]
    if rows < cols:
        q = q.T
    return gain * q


def init_mlp_params(key, input_size, output_size, dtype=jnp.float32):
    """Returns (padded_weights, packed_biases, raw_params).

    padded_weights: (d_in, 128), (128, 128), (128, 128), (128, d_out) matrices
                    in `dtype` (hidden padded to the lane width only).
    packed_biases:  (4, LANE) f32 (all zeros, per torch.nn.init.zeros_).
    raw_params:     unpadded [(w (in,out), b (out,)), ...] for the reference.
    """
    gain = float(np.sqrt(2.0))
    dims = [(input_size, HIDDEN), (HIDDEN, HIDDEN), (HIDDEN, HIDDEN),
            (HIDDEN, output_size)]
    keys = jax.random.split(key, len(dims))

    raw = []
    for k, (fan_in, fan_out) in zip(keys, dims):
        w_pt = _orthogonal(k, fan_out, fan_in, gain)        # (out, in) PyTorch layout
        raw.append((jnp.asarray(w_pt.T, dtype=jnp.float32), # (in, out) for x @ W
                    jnp.zeros((fan_out,), dtype=jnp.float32)))

    hid_pad = _round_up(HIDDEN, LANE)                       # 128
    # Pad only the dims feeding lane-dense intermediate matmuls; d_in of the
    # first layer and d_out of the last layer stay at their true widths.
    pad_shapes = [(input_size, hid_pad), (hid_pad, hid_pad),
                  (hid_pad, hid_pad), (hid_pad, output_size)]
    weights = tuple(
        jnp.pad(w, ((0, pi - w.shape[0]), (0, po - w.shape[1]))).astype(dtype)
        for (w, _), (pi, po) in zip(raw, pad_shapes))

    b_packed = jnp.stack(
        [jnp.pad(b, (0, LANE - b.shape[0])) for _, b in raw], axis=0)  # (4, LANE)

    return weights, b_packed, raw


def mlp_reference(x, raw_params):
    h = x
    for i, (w, b) in enumerate(raw_params):
        h = h @ w + b[None, :]
        if i < len(raw_params) - 1:
            h = _leaky_relu(h)
    return h


if __name__ == "__main__":
    key = jax.random.PRNGKey(0)
    k_param, k_x, k_x2 = jax.random.split(key, 3)

    input_size, output_size, batch = 16, 8, 4
    weights, b_packed, raw = init_mlp_params(k_param, input_size, output_size)

    # Small case (matches the original module's toy shapes).
    x = jax.random.normal(k_x, (batch, input_size), dtype=jnp.float32)
    out = jax.block_until_ready(mlp_forward(x, weights, b_packed))
    ref = mlp_reference(x, raw)
    np.testing.assert_allclose(np.asarray(out), np.asarray(ref),
                               rtol=1e-5, atol=1e-5)

    # Larger, non-aligned batch: exercises the balanced 2-tile grid (2 x 152)
    # plus the row-only padding path.
    x2 = jax.random.normal(k_x2, (300, input_size), dtype=jnp.float32)
    out2 = jax.block_until_ready(mlp_forward(x2, weights, b_packed))
    ref2 = mlp_reference(x2, raw)
    np.testing.assert_allclose(np.asarray(out2), np.asarray(ref2),
                               rtol=1e-5, atol=1e-5)

    # Optional bf16-MXU fast path (same kernel; only the weight dtype changes).
    # Accumulation / bias / LeakyReLU stay f32, so tolerance is ~bf16-level.
    weights_bf16 = tuple(w.astype(jnp.bfloat16) for w in weights)
    out3 = jax.block_until_ready(mlp_forward(x2, weights_bf16, b_packed))
    np.testing.assert_allclose(np.asarray(out3), np.asarray(ref2),
                               rtol=5e-2, atol=5e-2)

    print("KERNEL_OK")
</pallas_src>

<mosaic_0001>
module attributes {stable_mosaic.version = 11 : i64} {
  func.func @mlp_kernel(%arg0: i32, %arg1: memref<8x16xf32, #tpu.memory_space<vmem>>, %arg2: memref<16x128xf32, #tpu.memory_space<vmem>>, %arg3: memref<128x128xf32, #tpu.memory_space<vmem>>, %arg4: memref<128x128xf32, #tpu.memory_space<vmem>>, %arg5: memref<128x8xf32, #tpu.memory_space<vmem>>, %arg6: memref<4x128xf32, #tpu.memory_space<vmem>>, %arg7: memref<8x8xf32, #tpu.memory_space<vmem>>) attributes {dimension_semantics = [#tpu.dimension_semantics<parallel>], iteration_bounds = array<i64: 1>, scalar_prefetch = 0 : i64, scratch_operands = 0 : i64, tpu.core_type = #tpu.core_type<tc>, window_params = [{transform_indices = @transform_0, window_bounds = array<i64: 8, 16>}, {pipeline_mode = #tpu.pipeline_mode<synchronous>, transform_indices = @transform_1, window_bounds = array<i64: 16, 128>}, {pipeline_mode = #tpu.pipeline_mode<synchronous>, transform_indices = @transform_2, window_bounds = array<i64: 128, 128>}, {pipeline_mode = #tpu.pipeline_mode<synchronous>, transform_indices = @transform_3, window_bounds = array<i64: 128, 128>}, {pipeline_mode = #tpu.pipeline_mode<synchronous>, transform_indices = @transform_4, window_bounds = array<i64: 128, 8>}, {pipeline_mode = #tpu.pipeline_mode<synchronous>, transform_indices = @transform_5, window_bounds = array<i64: 4, 128>}, {transform_indices = @transform_6, window_bounds = array<i64: 8, 8>}]} {
    %c0 = arith.constant 0 : index
    %c0_0 = arith.constant 0 : index
    %0 = vector.load %arg6[%c0, %c0_0] : memref<4x128xf32, #tpu.memory_space<vmem>>, vector<4x128xf32>
    %c0_1 = arith.constant 0 : index
    %c0_2 = arith.constant 0 : index
    %1 = vector.load %arg1[%c0_1, %c0_2] : memref<8x16xf32, #tpu.memory_space<vmem>>, vector<8x16xf32>
    %c0_3 = arith.constant 0 : index
    %c0_4 = arith.constant 0 : index
    %2 = vector.load %arg2[%c0_3, %c0_4] : memref<16x128xf32, #tpu.memory_space<vmem>>, vector<16x128xf32>
    %cst = arith.constant dense<0.000000e+00> : vector<8x128xf32>
    %3 = tpu.matmul %1, %2, %cst {dimension_numbers = #tpu.dot_dimension_numbers<[1], [0], [0], [1], [0, 0, 1, 1], [], []>} : vector<8x16xf32>, vector<16x128xf32>, vector<8x128xf32> -> vector<8x128xf32>
    %4 = vector.extract_strided_slice %0 {offsets = [0, 0], sizes = [1, 128], strides = [1, 1]} : vector<4x128xf32> to vector<1x128xf32>
    %5 = vector.broadcast %4 : vector<1x128xf32> to vector<8x128xf32>
    %6 = arith.addf %3, %5 : vector<8x128xf32>
    %cst_5 = arith.constant 0.00999999977 : f32
    %7 = vector.broadcast %cst_5 : f32 to vector<8x128xf32>
    %8 = arith.mulf %7, %6 : vector<8x128xf32>
    %9 = arith.maximumf %6, %8 : vector<8x128xf32>
    %c0_6 = arith.constant 0 : index
    %c0_7 = arith.constant 0 : index
    %10 = vector.load %arg3[%c0_6, %c0_7] : memref<128x128xf32, #tpu.memory_space<vmem>>, vector<128x128xf32>
    %cst_8 = arith.constant dense<0.000000e+00> : vector<8x128xf32>
    %11 = tpu.matmul %9, %10, %cst_8 {dimension_numbers = #tpu.dot_dimension_numbers<[1], [0], [0], [1], [0, 0, 1, 1], [], []>} : vector<8x128xf32>, vector<128x128xf32>, vector<8x128xf32> -> vector<8x128xf32>
    %12 = vector.extract_strided_slice %0 {offsets = [1, 0], sizes = [1, 128], strides = [1, 1]} : vector<4x128xf32> to vector<1x128xf32>
    %13 = vector.broadcast %12 : vector<1x128xf32> to vector<8x128xf32>
    %14 = arith.addf %11, %13 : vector<8x128xf32>
    %cst_9 = arith.constant 0.00999999977 : f32
    %15 = vector.broadcast %cst_9 : f32 to vector<8x128xf32>
    %16 = arith.mulf %15, %14 : vector<8x128xf32>
    %17 = arith.maximumf %14, %16 : vector<8x128xf32>
    %c0_10 = arith.constant 0 : index
    %c0_11 = arith.constant 0 : index
    %18 = vector.load %arg4[%c0_10, %c0_11] : memref<128x128xf32, #tpu.memory_space<vmem>>, vector<128x128xf32>
    %cst_12 = arith.constant dense<0.000000e+00> : vector<8x128xf32>
    %19 = tpu.matmul %17, %18, %cst_12 {dimension_numbers = #tpu.dot_dimension_numbers<[1], [0], [0], [1], [0, 0, 1, 1], [], []>} : vector<8x128xf32>, vector<128x128xf32>, vector<8x128xf32> -> vector<8x128xf32>
    %20 = vector.extract_strided_slice %0 {offsets = [2, 0], sizes = [1, 128], strides = [1, 1]} : vector<4x128xf32> to vector<1x128xf32>
    %21 = vector.broadcast %20 : vector<1x128xf32> to vector<8x128xf32>
    %22 = arith.addf %19, %21 : vector<8x128xf32>
    %cst_13 = arith.constant 0.00999999977 : f32
    %23 = vector.broadcast %cst_13 : f32 to vector<8x128xf32>
    %24 = arith.mulf %23, %22 : vector<8x128xf32>
    %25 = arith.maximumf %22, %24 : vector<8x128xf32>
    %c0_14 = arith.constant 0 : index
    %c0_15 = arith.constant 0 : index
    %26 = vector.load %arg5[%c0_14, %c0_15] : memref<128x8xf32, #tpu.memory_space<vmem>>, vector<128x8xf32>
    %cst_16 = arith.constant dense<0.000000e+00> : vector<8x8xf32>
    %27 = tpu.matmul %25, %26, %cst_16 {dimension_numbers = #tpu.dot_dimension_numbers<[1], [0], [0], [1], [0, 0, 1, 1], [], []>} : vector<8x128xf32>, vector<128x8xf32>, vector<8x8xf32> -> vector<8x8xf32>
    %28 = vector.extract_strided_slice %0 {offsets = [3, 0], sizes = [1, 8], strides = [1, 1]} : vector<4x128xf32> to vector<1x8xf32>
    %29 = vector.broadcast %28 : vector<1x8xf32> to vector<8x8xf32>
    %30 = arith.addf %27, %29 : vector<8x8xf32>
    %c0_17 = arith.constant 0 : index
    %c0_18 = arith.constant 0 : index
    %31 = vector.load %arg7[%c0_17, %c0_18] : memref<8x8xf32, #tpu.memory_space<vmem>>, vector<8x8xf32>
    tpu.vector_store %arg7[%c0_17, %c0_18], %30 {strides = array<i32>} : memref<8x8xf32, #tpu.memory_space<vmem>>, vector<8x8xf32>,
    return
  }
  func.func @transform_0(%arg0: i32) -> (i32, i32) {
    %c0_i32 = arith.constant 0 : i32
    %c0_i32_0 = arith.constant 0 : i32
    return %arg0, %c0_i32 : i32, i32
  }
  func.func @transform_1(%arg0: i32) -> (i32, i32) {
    %c0_i32 = arith.constant 0 : i32
    %c0_i32_0 = arith.constant 0 : i32
    %c0_i32_1 = arith.constant 0 : i32
    return %c0_i32, %c0_i32_0 : i32, i32
  }
  func.func @transform_2(%arg0: i32) -> (i32, i32) {
    %c0_i32 = arith.constant 0 : i32
    %c0_i32_0 = arith.constant 0 : i32
    %c0_i32_1 = arith.constant 0 : i32
    return %c0_i32, %c0_i32_0 : i32, i32
  }
  func.func @transform_3(%arg0: i32) -> (i32, i32) {
    %c0_i32 = arith.constant 0 : i32
    %c0_i32_0 = arith.constant 0 : i32
    %c0_i32_1 = arith.constant 0 : i32
    return %c0_i32, %c0_i32_0 : i32, i32
  }
  func.func @transform_4(%arg0: i32) -> (i32, i32) {
    %c0_i32 = arith.constant 0 : i32
    %c0_i32_0 = arith.constant 0 : i32
    %c0_i32_1 = arith.constant 0 : i32
    return %c0_i32, %c0_i32_0 : i32, i32
  }
  func.func @transform_5(%arg0: i32) -> (i32, i32) {
    %c0_i32 = arith.constant 0 : i32
    %c0_i32_0 = arith.constant 0 : i32
    %c0_i32_1 = arith.constant 0 : i32
    return %c0_i32, %c0_i32_0 : i32, i32
  }
  func.func @transform_6(%arg0: i32) -> (i32, i32) {
    %c0_i32 = arith.constant 0 : i32
    %c0_i32_0 = arith.constant 0 : i32
    return %arg0, %c0_i32 : i32, i32
  }
}

</mosaic_0001>

<bundles_post_ra>
// kernel: mlp_forward.1
= control target key start
LH: loop header
LB: loop body
LE: loop exit
PB: predicated region body
PF: predicated region fallthrough
CT: control target
= control target key end

     0   :  { %11 = vsyncpa [#allocation3], 0  ;;  %s674_s21 = smov [#allocation2]   ;;  %s883_s0 = inlined_call_operand.vmem [shape: f32[8,16], index: 0, kind: input, shape index: {}]   ;;  %s884_s1 = inlined_call_operand.vmem [shape: f32[16,128], index: 1, kind: input, shape index: {}]   ;;  %s885_s2 = inlined_call_operand.vmem [shape: f32[128,128], index: 2, kind: input, shape index: {}]   ;;  %s886_s3 = inlined_call_operand.hbm [shape: f32[128,128], index: 3, kind: input, shape index: {}]   ;;  %s887_s4 = inlined_call_operand.vmem [shape: f32[128,8], index: 4, kind: input, shape index: {}]   ;;  %s888_s5 = inlined_call_operand.vmem [shape: f32[4,128], index: 5, kind: input, shape index: {}]   ;;  %s889_s6 = inlined_call_operand.vmem [shape: f32[8,8], index: 6, kind: output, shape index: {}]  }
   0x1   :  { %s23_s22 = sshll.u32 %s674_s21, 4  ;;  %s650_s25 = scalar_lea.hbm %s886_s3, 2048  ;;  %s24_s22 = int_to_ptr.vmem [resolvable:$true] %s23_s22 }
   0x2   :  { %p651_p0 = scmp.ne.s32.totalorder %s886_s3, %s650_s25  ;;  %p654_p1 = scmp.lt.u32.totalorder %s650_s25, %s886_s3 }
   0x4   :  { %p656_p2 = pnand %p654_p1, %p651_p0 }
   0x6   :  { %659 = shalt.err (!%p656_p2)
}
   0x7   :  { %s660_s30 = scalar_lea.vmem %s24_s22, 2048  ;;  %p665_p4 = scmp.lt.s32.totalorder %s24_s22, %s24_s22 }
   0x8   :  { %p661_p3 = scmp.ne.s32.totalorder %s24_s22, %s660_s30  ;;  %p666_p5 = scmp.lt.s32.totalorder %s660_s30, %s660_s30 }
   0xa   :  { %p667_p6 = por %p666_p5, %p665_p4 }
   0xc   :  { %p668_p7 = pnand %p667_p6, %p661_p3 }
   0xe   :  { %671 = shalt.err (!%p668_p7)
}
   0xf   :  { %s675_s7 = smov 128   ;;  %s676_s8 = smov 8  }
  0x10   :  { %29 = dma.hbm_to_vmem [thread:$0]  %s886_s3, 2048, %s24_s22, [#allocation3], %s675_s7, %s675_s7, %s676_s8  }
  0x11   :  { %672 = dma.done.wait [#allocation3], 2048  }
  0x12   :  { %673 = vsyncadd [#allocation3], 4294965248  ;;  %v677_v0 = vmov 0.0|0.0   ;;  %vm678_vm0 = vmmov 0   ;;  %v679_v1 = vmov 0.0   ;;  %v39_v2 = vld [vmem:[%s884_s1] sm:$0xff]  ;;  %v41_v48 = vlaneseq }
  0x13   :  { %569 = vmatprep.subr.bf16.mxu0 %v677_v0  ;;  %461 = vmatprep.mubr.msk.f32.mxu0 %vm678_vm0, %v679_v1  ;;  %v40_v3 = vld [vmem:[%s884_s1 + $0x8] sm:$0xff]  ;;  %v121_v5 = vld [vmem:[%s885_s2] sm:$0xff]  ;;  %v123_v7 = vld [vmem:[%s885_s2 + $0x10] sm:$0xff]  ;;  %vm45_vm1 = vcmask 130048   ;;  %vm395_vm2 = vcmask 64512  }
  0x14   :  { %572 = vmatprep.subr.bf16.mxu1 %v677_v0  ;;  %496 = vmatprep.mubr.msk.f32.mxu1 %vm678_vm0, %v679_v1  ;;  %v570_v4 = vpack.c.bf16 %v40_v3, %v39_v2  ;;  %v122_v6 = vld [vmem:[%s885_s2 + $0x8] sm:$0xff]  ;;  %v124_v9 = vld [vmem:[%s885_s2 + $0x18] sm:$0xff]  ;;  %v38_v10 = vld [vmem:[%s883_s0] sm:$0xff]  ;;  %v807_v49 = vshrl.u32 %v41_v48, 7 }
  0x15   :  { %v573_v8 = vpack.c.bf16 %v122_v6, %v121_v5  ;;  %v576_v11 = vpack.c.bf16 %v124_v9, %v123_v7  ;;  %v125_v12 = vld [vmem:[%s885_s2 + $0x20] sm:$0xff]  ;;  %v126_v13 = vld [vmem:[%s885_s2 + $0x28] sm:$0xff]  ;;  %v127_v15 = vld [vmem:[%s885_s2 + $0x30] sm:$0xff] }
  0x16   :  { %571 = vmatpush3.bf16.msra.mxu0 %v570_v4  ;;  %v579_v14 = vpack.c.bf16 %v126_v13, %v125_v12  ;;  %v128_v16 = vld [vmem:[%s885_s2 + $0x38] sm:$0xff]  ;;  %v129_v18 = vld [vmem:[%s885_s2 + $0x40] sm:$0xff]  ;;  %v130_v19 = vld [vmem:[%s885_s2 + $0x48] sm:$0xff]  ;;  %v43_v50 = vsub.s32 0, %v807_v49 }
  0x17   :  { %574 = vmatpush3.bf16.msra.mxu1 %v573_v8  ;;  %596 = vmatprep.subr.bf16.mxu0 %v677_v0  ;;  %v582_v17 = vpack.c.bf16 %v128_v16, %v127_v15  ;;  %v585_v20 = vpack.c.bf16 %v130_v19, %v129_v18  ;;  %v131_v21 = vld [vmem:[%s885_s2 + $0x50] sm:$0xff]  ;;  %v132_v22 = vld [vmem:[%s885_s2 + $0x58] sm:$0xff]  ;;  %v133_v24 = vld [vmem:[%s885_s2 + $0x60] sm:$0xff]  ;;  %v139_v19 = vsub.s32 1, %v807_v49 }
  0x18   :  { %575 = vmatprep.subr.bf16.mxu1 %v677_v0  ;;  %v588_v23 = vpack.c.bf16 %v132_v22, %v131_v21  ;;  %v134_v25 = vld [vmem:[%s885_s2 + $0x68] sm:$0xff]  ;;  %v135_v27 = vld [vmem:[%s885_s2 + $0x70] sm:$0xff]  ;;  %v136_v28 = vld [vmem:[%s885_s2 + $0x78] sm:$0xff] }
  0x19   :  { %462 = vmatmul.mubr.msk.f32.vlgmr.msra.gmra.mrb[0].mxu0 %vm45_vm1, %v38_v10  ;;  %v591_v26 = vpack.c.bf16 %v134_v25, %v133_v24  ;;  %v594_v29 = vpack.c.bf16 %v136_v28, %v135_v27  ;;  %v213_v30 = vld [vmem:[#allocation2] sm:$0xff]  ;;  %v214_v31 = vld [vmem:[#allocation2 + $0x8] sm:$0xff]  ;;  %v215_v32 = vld [vmem:[#allocation2 + $0x10] sm:$0xff] }
  0x1a   :  { %531 = vmatprep.mubr.msk.f32.mxu0 %vm678_vm0, %v679_v1  ;;  %v597_v33 = vpack.c.bf16 %v214_v31, %v213_v30  ;;  %v216_v34 = vld [vmem:[#allocation2 + $0x18] sm:$0xff]  ;;  %v217_v36 = vld [vmem:[#allocation2 + $0x20] sm:$0xff]  ;;  %v218_v37 = vld [vmem:[#allocation2 + $0x28] sm:$0xff] }
  0x1b   :  { %577 = vmatpush3.bf16.msra.mxu1 %v576_v11  ;;  %v600_v35 = vpack.c.bf16 %v216_v34, %v215_v32  ;;  %v603_v38 = vpack.c.bf16 %v218_v37, %v217_v36  ;;  %v219_v39 = vld [vmem:[#allocation2 + $0x30] sm:$0xff]  ;;  %v220_v40 = vld [vmem:[#allocation2 + $0x38] sm:$0xff]  ;;  %v221_v42 = vld [vmem:[#allocation2 + $0x40] sm:$0xff]  ;;  %v231_v32 = vsub.s32 2, %v807_v49 }
  0x1c   :  { %578 = vmatprep.subr.bf16.mxu1 %v677_v0  ;;  %598 = vmatpush3.bf16.msra.mxu0 %v597_v33  ;;  %v606_v41 = vpack.c.bf16 %v220_v40, %v219_v39  ;;  %v222_v43 = vld [vmem:[#allocation2 + $0x48] sm:$0xff]  ;;  %v223_v45 = vld [vmem:[#allocation2 + $0x50] sm:$0xff]  ;;  %v224_v46 = vld [vmem:[#allocation2 + $0x58] sm:$0xff] }
  0x1d   :  { %599 = vmatprep.subr.bf16.mxu0 %v677_v0  ;;  %v609_v44 = vpack.c.bf16 %v222_v43, %v221_v42  ;;  %v612_v47 = vpack.c.bf16 %v224_v46, %v223_v45  ;;  %v813_v51 = vld [vmem:[%s888_s5] sm:$0xf]  ;;  %v225_v58 = vld [vmem:[#allocation2 + $0x60] sm:$0xff]  ;;  %v226_v59 = vld [vmem:[#allocation2 + $0x68] sm:$0xff] }
  0x1e   :  { %v44_v52 = vrot.slane %v813_v51, %v43_v50  ;;  %v615_v60 = vpack.c.bf16 %v226_v59, %v225_v58  ;;  %v227_v61 = vld [vmem:[#allocation2 + $0x70] sm:$0xff]  ;;  %v228_v62 = vld [vmem:[#allocation2 + $0x78] sm:$0xff]  ;;  %v306_v3 = vld [vmem:[%s887_s4 + $0x8] sm:$0xff]  ;;  %v232_v33 = vrot.slane %v813_v51, %v231_v32 }
  0x1f   :  { %580 = vmatpush3.bf16.msra.mxu1 %v579_v14  ;;  %v618_v63 = vpack.c.bf16 %v228_v62, %v227_v61  ;;  %v305_v2 = vld [vmem:[%s887_s4] sm:$0xff]  ;;  %v308_v5 = vld [vmem:[%s887_s4 + $0x18] sm:$0xff]  ;;  %v310_v8 = vld [vmem:[%s887_s4 + $0x28] sm:$0xff] }
  0x20   :  { %581 = vmatprep.subr.bf16.mxu1 %v677_v0  ;;  %601 = vmatpush3.bf16.msra.mxu0 %v600_v35  ;;  %v621_v4 = vpack.c.bf16 %v306_v3, %v305_v2  ;;  %v309_v7 = vld [vmem:[%s887_s4 + $0x20] sm:$0xff]  ;;  %v311_v10 = vld [vmem:[%s887_s4 + $0x30] sm:$0xff]  ;;  %v312_v11 = vld [vmem:[%s887_s4 + $0x38] sm:$0xff] }
  0x21   :  { %602 = vmatprep.subr.bf16.mxu0 %v677_v0  ;;  %v627_v9 = vpack.c.bf16 %v310_v8, %v309_v7  ;;  %v630_v12 = vpack.c.bf16 %v312_v11, %v311_v10  ;;  %v313_v13 = vld [vmem:[%s887_s4 + $0x40] sm:$0xff]  ;;  %v314_v14 = vld [vmem:[%s887_s4 + $0x48] sm:$0xff]  ;;  %v315_v16 = vld [vmem:[%s887_s4 + $0x50] sm:$0xff] }
  0x22   :  { %v633_v15 = vpack.c.bf16 %v314_v14, %v313_v13  ;;  %v318_v27 = vld [vmem:[%s887_s4 + $0x68] sm:$0xff]  ;;  %v320_v30 = vld [vmem:[%s887_s4 + $0x78] sm:$0xff] }
  0x23   :  { %583 = vmatpush3.bf16.msra.mxu1 %v582_v17  ;;  %v316_v17 = vld [vmem:[%s887_s4 + $0x58] sm:$0xff] }
  0x24   :  { %584 = vmatprep.subr.bf16.mxu1 %v677_v0  ;;  %604 = vmatpush3.bf16.msra.mxu0 %v603_v38  ;;  %v636_v18 = vpack.c.bf16 %v316_v17, %v315_v16 }
  0x25   :  { %605 = vmatprep.subr.bf16.mxu0 %v677_v0 }
  0x27   :  { %586 = vmatpush3.bf16.msra.mxu1 %v585_v20  ;;  %v140_v20 = vrot.slane %v813_v51, %v139_v19 }
  0x28   :  { %587 = vmatprep.subr.bf16.mxu1 %v677_v0  ;;  %607 = vmatpush3.bf16.msra.mxu0 %v606_v41 }
  0x29   :  { %608 = vmatprep.subr.bf16.mxu0 %v677_v0 }
  0x2b   :  { %589 = vmatpush3.bf16.msra.mxu1 %v588_v23 }
  0x2c   :  { %590 = vmatprep.subr.bf16.mxu1 %v677_v0  ;;  %610 = vmatpush3.bf16.msra.mxu0 %v609_v44 }
  0x2d   :  { %611 = vmatprep.subr.bf16.mxu0 %v677_v0 }
  0x2f   :  { %592 = vmatpush3.bf16.msra.mxu1 %v591_v26  ;;  %v317_v26 = vld [vmem:[%s887_s4 + $0x60] sm:$0xff] }
  0x30   :  { %593 = vmatprep.subr.bf16.mxu1 %v677_v0  ;;  %613 = vmatpush3.bf16.msra.mxu0 %v612_v47  ;;  %v639_v28 = vpack.c.bf16 %v318_v27, %v317_v26 }
  0x31   :  { %614 = vmatprep.subr.bf16.mxu0 %v677_v0 }
  0x33   :  { %595 = vmatpush3.bf16.msra.mxu1 %v594_v29  ;;  %v319_v29 = vld [vmem:[%s887_s4 + $0x70] sm:$0xff] }
  0x34   :  { %620 = vmatprep.subr.bf16.mxu1 %v677_v0  ;;  %616 = vmatpush3.bf16.msra.mxu0 %v615_v60  ;;  %v642_v31 = vpack.c.bf16 %v320_v30, %v319_v29 }
  0x35   :  { %617 = vmatprep.subr.bf16.mxu0 %v677_v0 }
  0x38   :  { %619 = vmatpush3.bf16.msra.mxu0 %v618_v63 }
  0xec   :  { %v115_v53 = vpop.f32.mrb[0].mxu0 }
  0xed   :  { %v116_v54 = vadd.f32 %v115_v53, %v44_v52  ;;  %v463_v55 = vpop.f32.mrb[1].mxu0 }
  0xef   :  { %v119_v56 = vmul.f32 0.01, %v116_v54 }
  0xf1   :  { %v120_v57 = vmax.f32 %v116_v54, %v119_v56 }
  0xf3   :  { %497 = vmatmul.mubr.f32.vlgmr.msra.gmra.mrb[0].mxu1 %v120_v57 }
  0xf4   :  { %566 = vmatprep.mubr.msk.f32.mxu1 %vm678_vm0, %v679_v1  ;;  %v307_v1 = vld [vmem:[%s887_s4 + $0x10] sm:$0xff]  ;;  %622 = vmatpush3.bf16.msra.mxu1 %v621_v4 }
  0xf5   :  { %v624_v6 = vpack.c.bf16 %v308_v5, %v307_v1  ;;  %623 = vmatprep.subr.bf16.mxu1 %v677_v0 }
  0xf8   :  { %625 = vmatpush3.bf16.msra.mxu1 %v624_v6 }
  0xf9   :  { %626 = vmatprep.subr.bf16.mxu1 %v677_v0 }
  0xfc   :  { %628 = vmatpush3.bf16.msra.mxu1 %v627_v9 }
  0xfd   :  { %629 = vmatprep.subr.bf16.mxu1 %v677_v0 }
 0x100   :  { %631 = vmatpush3.bf16.msra.mxu1 %v630_v12 }
 0x101   :  { %632 = vmatprep.subr.bf16.mxu1 %v677_v0 }
 0x104   :  { %634 = vmatpush3.bf16.msra.mxu1 %v633_v15 }
 0x105   :  { %635 = vmatprep.subr.bf16.mxu1 %v677_v0 }
 0x108   :  { %637 = vmatpush3.bf16.msra.mxu1 %v636_v18 }
 0x109   :  { %638 = vmatprep.subr.bf16.mxu1 %v677_v0 }
 0x10c   :  { %640 = vmatpush3.bf16.msra.mxu1 %v639_v28 }
 0x10d   :  { %641 = vmatprep.subr.bf16.mxu1 %v677_v0  ;;  %v323_v0 = vsub.s32 3, %v807_v49 }
 0x10f   :  { %v324_v39 = vrot.slane %v813_v51, %v323_v0 }
 0x110   :  { %643 = vmatpush3.bf16.msra.mxu1 %v642_v31 }
 0x1c6   :  { %v207_v21 = vpop.f32.mrb[0].mxu1 }
 0x1c7   :  { %v208_v22 = vadd.f32 %v207_v21, %v140_v20  ;;  %v498_v23 = vpop.f32.mrb[1].mxu1 }
 0x1c9   :  { %v211_v24 = vmul.f32 0.01, %v208_v22 }
 0x1cb   :  { %v212_v25 = vmax.f32 %v208_v22, %v211_v24 }
 0x1cd   :  { %532 = vmatmul.mubr.f32.vlgmr.msra.gmra.mrb[2].mxu0 %v212_v25 }
 0x2a0   :  { %v299_v34 = vpop.f32.mrb[2].mxu0 }
 0x2a1   :  { %v300_v35 = vadd.f32 %v299_v34, %v232_v33  ;;  %v533_v36 = vpop.f32.mrb[3].mxu0 }
 0x2a3   :  { %v303_v37 = vmul.f32 0.01, %v300_v35 }
 0x2a5   :  { %v304_v38 = vmax.f32 %v300_v35, %v303_v37 }
 0x2a7   :  { %567 = vmatmul.mubr.f32.vlgmr.msra.gmra.mrb[2].mxu1 %v304_v38 }
 0x37a   :  { %v391_v40 = vpop.f32.mrb[2].mxu1 }
 0x37b   :  { %v392_v41 = vadd.f32 %v391_v40, %v324_v39  ;;  %v568_v42 = vpop.f32.mrb[3].mxu1 }
 0x37d   :  { %396 = vst.msk [vmem:[%s889_s6] sm:$0xff] %vm395_vm2, %v392_v41 }
 0x37e   :  { %401 = vsyncpa [#allocation3], 1 }

</bundles_post_ra>
